<compile_context>
chip_gen: v6e
topology: v6e:2x2x1
jax: 0.10.0
libtpu: 0.0.40
codegen_flags: <defaults>
</compile_context>

<pallas_src>
import functools

import jax
import jax.numpy as jnp
import numpy as np
from jax.experimental import pallas as pl
from jax.experimental.pallas import tpu as pltpu

# ---- config (matches a typical volume-radiance config) ----------------------
N_DIR_DIMS = 3
SH_DEGREE = 4
SH_DIM = SH_DEGREE * SH_DEGREE          # 16 encoding outputs
FEAT_DIM = 16                           # config.input_feature_dim
IN_DIM = FEAT_DIM + SH_DIM              # 32
HIDDEN = 64                             # mlp n_neurons
OUT_DIM = 3                             # n_output_dims


def _sh4_terms(x, y, z):
    """Real spherical harmonics, degree 4 (16 coeffs), tiny-cuda-nn ordering.

    x, y, z are (1, TM) lane-dense rows; every term is pure VPU work.
    """
    x2, y2, z2 = x * x, y * y, z * z
    xy, yz, xz = x * y, y * z, x * z
    return [
        jnp.full_like(x, 0.28209479177387814),
        -0.48860251190291987 * y,
        0.48860251190291987 * z,
        -0.48860251190291987 * x,
        1.0925484305920792 * xy,
        -1.0925484305920792 * yz,
        0.94617469575755997 * z2 - 0.31539156525251999,
        -1.0925484305920792 * xz,
        0.54627421529603959 * (x2 - y2),
        0.59004358992664352 * y * (-3.0 * x2 + y2),
        2.8906114426405538 * xy * z,
        0.45704579946446572 * y * (1.0 - 5.0 * z2),
        0.3731763325901154 * z * (5.0 * z2 - 3.0),
        0.45704579946446572 * x * (1.0 - 5.0 * z2),
        1.4453057213202769 * z * (x2 - y2),
        0.59004358992664352 * x * (x2 - 3.0 * y2),
    ]


def volume_radiance_kernel(feat_ref, dirs_ref, w1f_ref, w1s_ref, w2_ref, w3_ref,
                           o_ref):
    # --- direction encoding ---------------------------------------------------
    # forward() does (dirs+1)/2 and the tcnn SH encoding remaps [0,1] -> [-1,1];
    # the composition is the identity, so use dirs directly.
    x = dirs_ref[0:1, :]                       # (1, TM) lane-dense
    y = dirs_ref[1:2, :]
    z = dirs_ref[2:3, :]
    sh = jnp.concatenate(_sh4_terms(x, y, z), axis=0)         # (16, TM), sublane stack

    # --- MLP hot path (MXU matmuls on bf16 operands, f32 accumulation) -------
    # w1 is split so no feature||sh concat is needed:
    #   h1 = relu(w1_feat^T @ feat^T + w1_sh^T @ sh^T)
    h = jnp.dot(w1f_ref[...], feat_ref[...],
                preferred_element_type=jnp.float32)           # (H, TM)
    h = h + jnp.dot(w1s_ref[...], sh.astype(jnp.bfloat16),
                    preferred_element_type=jnp.float32)
    h = jnp.maximum(h, 0.0)

    h = jnp.dot(w2_ref[...], h.astype(jnp.bfloat16),
                preferred_element_type=jnp.float32)           # (H, TM)
    h = jnp.maximum(h, 0.0)

    logits = jnp.dot(w3_ref[...], h.astype(jnp.bfloat16),
                     preferred_element_type=jnp.float32)      # (3, TM)

    # color_activation = sigmoid, applied on lane-dense (3, TM) rows (EUP),
    # stored with unmasked vst.
    o_ref[...] = jax.nn.sigmoid(logits)


def _pick_tm(n):
    """Lane-axis tile width: as large as useful, but keep >=2 grid steps when
    possible so the 'parallel' axis can shard across v7x's two TensorCores."""
    n128 = ((n + 127) // 128) * 128
    for tm in (1024, 512, 256, 128):
        if n128 >= 2 * tm:
            return tm
    return min(n128, 1024)


@jax.jit
def volume_radiance(features, dirs, w1, w2, w3):
    lead_shape = features.shape[:-1]
    feat = features.reshape(-1, FEAT_DIM).astype(jnp.float32)
    d = dirs.reshape(-1, N_DIR_DIMS).astype(jnp.float32)

    n = feat.shape[0]
    tm = _pick_tm(n)
    n_pad = ((n + tm - 1) // tm) * tm
    if n_pad != n:
        feat = jnp.pad(feat, ((0, n_pad - n), (0, 0)))
        d = jnp.pad(d, ((0, n_pad - n), (0, 0)))

    # Channel-on-sublane layout (layout plumbing stays in the XLA wrapper).
    feat_t = feat.T.astype(jnp.bfloat16)                     # (FEAT_DIM, n_pad)
    dirs_t = d.T                                             # (3, n_pad) f32
    w1f_t = w1[:FEAT_DIM, :].T.astype(jnp.bfloat16)          # (H, FEAT_DIM)
    w1s_t = w1[FEAT_DIM:, :].T.astype(jnp.bfloat16)          # (H, SH_DIM)
    w2_t = w2.T.astype(jnp.bfloat16)                         # (H, H)
    w3_t = w3.T.astype(jnp.bfloat16)                         # (OUT_DIM, H)

    out_t = pl.pallas_call(
        volume_radiance_kernel,
        out_shape=jax.ShapeDtypeStruct((OUT_DIM, n_pad), jnp.float32),
        grid_spec=pltpu.PrefetchScalarGridSpec(
            num_scalar_prefetch=0,
            grid=(n_pad // tm,),
            in_specs=[
                pl.BlockSpec((FEAT_DIM, tm), lambda i: (0, i)),
                pl.BlockSpec((N_DIR_DIMS, tm), lambda i: (0, i)),
                pl.BlockSpec((HIDDEN, FEAT_DIM), lambda i: (0, 0)),
                pl.BlockSpec((HIDDEN, SH_DIM), lambda i: (0, 0)),
                pl.BlockSpec((HIDDEN, HIDDEN), lambda i: (0, 0)),
                pl.BlockSpec((OUT_DIM, HIDDEN), lambda i: (0, 0)),
            ],
            out_specs=pl.BlockSpec((OUT_DIM, tm), lambda i: (0, i)),
        ),
        compiler_params=pltpu.CompilerParams(
            dimension_semantics=("parallel",)),
    )(feat_t, dirs_t, w1f_t, w1s_t, w2_t, w3_t)

    color = out_t[:, :n].T                                   # (n, 3) f32
    return color.reshape(*lead_shape, OUT_DIM)


# ---- pure-JAX f32 reference (for correctness check) --------------------------
def volume_radiance_ref(features, dirs, w1, w2, w3):
    feat = features.reshape(-1, features.shape[-1]).astype(jnp.float32)
    d = dirs.reshape(-1, N_DIR_DIMS).astype(jnp.float32)
    u = (d + 1.0) * 0.5
    d2 = 2.0 * u - 1.0
    x, y, z = d2[:, 0:1], d2[:, 1:2], d2[:, 2:3]
    sh = jnp.concatenate(
        [t if t.ndim == 2 else t for t in _sh4_terms(x, y, z)], axis=-1)
    inp = jnp.concatenate([feat, sh], axis=-1)
    h = jax.nn.relu(inp @ w1)
    h = jax.nn.relu(h @ w2)
    color = jax.nn.sigmoid(h @ w3)
    return color.reshape(*features.shape[:-1], OUT_DIM)


if __name__ == "__main__":
    key = jax.random.PRNGKey(0)
    k_feat, k_dirs, k_w1, k_w2, k_w3 = jax.random.split(key, 5)

    # small shapes: batch=2, n_rays=100, feature_dim=16 -> N=200 points
    B, R = 2, 100
    features = jax.random.normal(k_feat, (B, R, FEAT_DIM), dtype=jnp.float32)
    raw_dirs = jax.random.normal(k_dirs, (B, R, N_DIR_DIMS), dtype=jnp.float32)
    dirs = raw_dirs / (jnp.linalg.norm(raw_dirs, axis=-1, keepdims=True) + 1e-8)

    # deterministic weight init (tcnn FullyFusedMLP has no bias)
    w1 = jax.random.normal(k_w1, (IN_DIM, HIDDEN), dtype=jnp.float32) * (2.0 / IN_DIM) ** 0.5
    w2 = jax.random.normal(k_w2, (HIDDEN, HIDDEN), dtype=jnp.float32) * (2.0 / HIDDEN) ** 0.5
    w3 = jax.random.normal(k_w3, (HIDDEN, OUT_DIM), dtype=jnp.float32) * (2.0 / HIDDEN) ** 0.5

    out = volume_radiance(features, dirs, w1, w2, w3)
    out = jax.block_until_ready(out)

    ref = jax.block_until_ready(volume_radiance_ref(features, dirs, w1, w2, w3))
    # bf16 matmul operands (f32 accumulation) vs f32 reference -> relaxed tol.
    np.testing.assert_allclose(np.asarray(out), np.asarray(ref),
                               rtol=2.5e-2, atol=2.5e-2)
    assert out.shape == (B, R, OUT_DIM) and out.dtype == jnp.float32

    print("KERNEL_OK")
</pallas_src>

<mosaic_0001>
module attributes {stable_mosaic.version = 11 : i64} {
  func.func @volume_radiance_kernel(%arg0: i32, %arg1: memref<16x128xbf16, #tpu.memory_space<vmem>>, %arg2: memref<3x128xf32, #tpu.memory_space<vmem>>, %arg3: memref<64x16xbf16, #tpu.memory_space<vmem>>, %arg4: memref<64x16xbf16, #tpu.memory_space<vmem>>, %arg5: memref<64x64xbf16, #tpu.memory_space<vmem>>, %arg6: memref<3x64xbf16, #tpu.memory_space<vmem>>, %arg7: memref<3x128xf32, #tpu.memory_space<vmem>>) attributes {dimension_semantics = [#tpu.dimension_semantics<parallel>], iteration_bounds = array<i64: 2>, scalar_prefetch = 0 : i64, scratch_operands = 0 : i64, tpu.core_type = #tpu.core_type<tc>, window_params = [{transform_indices = @transform_0, window_bounds = array<i64: 16, 128>}, {transform_indices = @transform_1, window_bounds = array<i64: 3, 128>}, {pipeline_mode = #tpu.pipeline_mode<synchronous>, transform_indices = @transform_2, window_bounds = array<i64: 64, 16>}, {pipeline_mode = #tpu.pipeline_mode<synchronous>, transform_indices = @transform_3, window_bounds = array<i64: 64, 16>}, {pipeline_mode = #tpu.pipeline_mode<synchronous>, transform_indices = @transform_4, window_bounds = array<i64: 64, 64>}, {pipeline_mode = #tpu.pipeline_mode<synchronous>, transform_indices = @transform_5, window_bounds = array<i64: 3, 64>}, {transform_indices = @transform_6, window_bounds = array<i64: 3, 128>}]} {
    %c0 = arith.constant 0 : index
    %c0_0 = arith.constant 0 : index
    %0 = vector.load %arg2[%c0, %c0_0] : memref<3x128xf32, #tpu.memory_space<vmem>>, vector<1x128xf32>
    %c1 = arith.constant 1 : index
    %c0_1 = arith.constant 0 : index
    %1 = vector.load %arg2[%c1, %c0_1] : memref<3x128xf32, #tpu.memory_space<vmem>>, vector<1x128xf32>
    %c2 = arith.constant 2 : index
    %c0_2 = arith.constant 0 : index
    %2 = vector.load %arg2[%c2, %c0_2] : memref<3x128xf32, #tpu.memory_space<vmem>>, vector<1x128xf32>
    %3 = arith.mulf %0, %0 : vector<1x128xf32>
    %4 = arith.mulf %1, %1 : vector<1x128xf32>
    %5 = arith.mulf %2, %2 : vector<1x128xf32>
    %6 = arith.mulf %0, %1 : vector<1x128xf32>
    %7 = arith.mulf %1, %2 : vector<1x128xf32>
    %8 = arith.mulf %0, %2 : vector<1x128xf32>
    %cst = arith.constant 0.282094806 : f32
    %9 = vector.broadcast %cst : f32 to vector<1x128xf32>
    %cst_3 = arith.constant -0.488602519 : f32
    %10 = vector.broadcast %cst_3 : f32 to vector<1x128xf32>
    %11 = arith.mulf %10, %1 : vector<1x128xf32>
    %cst_4 = arith.constant 0.488602519 : f32
    %12 = vector.broadcast %cst_4 : f32 to vector<1x128xf32>
    %13 = arith.mulf %12, %2 : vector<1x128xf32>
    %cst_5 = arith.constant -0.488602519 : f32
    %14 = vector.broadcast %cst_5 : f32 to vector<1x128xf32>
    %15 = arith.mulf %14, %0 : vector<1x128xf32>
    %cst_6 = arith.constant 1.09254849 : f32
    %16 = vector.broadcast %cst_6 : f32 to vector<1x128xf32>
    %17 = arith.mulf %16, %6 : vector<1x128xf32>
    %cst_7 = arith.constant -1.09254849 : f32
    %18 = vector.broadcast %cst_7 : f32 to vector<1x128xf32>
    %19 = arith.mulf %18, %7 : vector<1x128xf32>
    %cst_8 = arith.constant 0.946174681 : f32
    %20 = vector.broadcast %cst_8 : f32 to vector<1x128xf32>
    %21 = arith.mulf %20, %5 : vector<1x128xf32>
    %cst_9 = arith.constant 0.31539157 : f32
    %22 = vector.broadcast %cst_9 : f32 to vector<1x128xf32>
    %23 = arith.subf %21, %22 : vector<1x128xf32>
    %cst_10 = arith.constant -1.09254849 : f32
    %24 = vector.broadcast %cst_10 : f32 to vector<1x128xf32>
    %25 = arith.mulf %24, %8 : vector<1x128xf32>
    %26 = arith.subf %3, %4 : vector<1x128xf32>
    %cst_11 = arith.constant 0.546274245 : f32
    %27 = vector.broadcast %cst_11 : f32 to vector<1x128xf32>
    %28 = arith.mulf %27, %26 : vector<1x128xf32>
    %cst_12 = arith.constant 0.590043604 : f32
    %29 = vector.broadcast %cst_12 : f32 to vector<1x128xf32>
    %30 = arith.mulf %29, %1 : vector<1x128xf32>
    %cst_13 = arith.constant -3.000000e+00 : f32
    %31 = vector.broadcast %cst_13 : f32 to vector<1x128xf32>
    %32 = arith.mulf %31, %3 : vector<1x128xf32>
    %33 = arith.addf %32, %4 : vector<1x128xf32>
    %34 = arith.mulf %30, %33 : vector<1x128xf32>
    %cst_14 = arith.constant 2.89061141 : f32
    %35 = vector.broadcast %cst_14 : f32 to vector<1x128xf32>
    %36 = arith.mulf %35, %6 : vector<1x128xf32>
    %37 = arith.mulf %36, %2 : vector<1x128xf32>
    %cst_15 = arith.constant 0.457045794 : f32
    %38 = vector.broadcast %cst_15 : f32 to vector<1x128xf32>
    %39 = arith.mulf %38, %1 : vector<1x128xf32>
    %cst_16 = arith.constant 5.000000e+00 : f32
    %40 = vector.broadcast %cst_16 : f32 to vector<1x128xf32>
    %41 = arith.mulf %40, %5 : vector<1x128xf32>
    %cst_17 = arith.constant 1.000000e+00 : f32
    %42 = vector.broadcast %cst_17 : f32 to vector<1x128xf32>
    %43 = arith.subf %42, %41 : vector<1x128xf32>
    %44 = arith.mulf %39, %43 : vector<1x128xf32>
    %cst_18 = arith.constant 0.373176336 : f32
    %45 = vector.broadcast %cst_18 : f32 to vector<1x128xf32>
    %46 = arith.mulf %45, %2 : vector<1x128xf32>
    %cst_19 = arith.constant 5.000000e+00 : f32
    %47 = vector.broadcast %cst_19 : f32 to vector<1x128xf32>
    %48 = arith.mulf %47, %5 : vector<1x128xf32>
    %cst_20 = arith.constant 3.000000e+00 : f32
    %49 = vector.broadcast %cst_20 : f32 to vector<1x128xf32>
    %50 = arith.subf %48, %49 : vector<1x128xf32>
    %51 = arith.mulf %46, %50 : vector<1x128xf32>
    %cst_21 = arith.constant 0.457045794 : f32
    %52 = vector.broadcast %cst_21 : f32 to vector<1x128xf32>
    %53 = arith.mulf %52, %0 : vector<1x128xf32>
    %cst_22 = arith.constant 5.000000e+00 : f32
    %54 = vector.broadcast %cst_22 : f32 to vector<1x128xf32>
    %55 = arith.mulf %54, %5 : vector<1x128xf32>
    %cst_23 = arith.constant 1.000000e+00 : f32
    %56 = vector.broadcast %cst_23 : f32 to vector<1x128xf32>
    %57 = arith.subf %56, %55 : vector<1x128xf32>
    %58 = arith.mulf %53, %57 : vector<1x128xf32>
    %cst_24 = arith.constant 1.44530571 : f32
    %59 = vector.broadcast %cst_24 : f32 to vector<1x128xf32>
    %60 = arith.mulf %59, %2 : vector<1x128xf32>
    %61 = arith.subf %3, %4 : vector<1x128xf32>
    %62 = arith.mulf %60, %61 : vector<1x128xf32>
    %cst_25 = arith.constant 0.590043604 : f32
    %63 = vector.broadcast %cst_25 : f32 to vector<1x128xf32>
    %64 = arith.mulf %63, %0 : vector<1x128xf32>
    %cst_26 = arith.constant 3.000000e+00 : f32
    %65 = vector.broadcast %cst_26 : f32 to vector<1x128xf32>
    %66 = arith.mulf %65, %4 : vector<1x128xf32>
    %67 = arith.subf %3, %66 : vector<1x128xf32>
    %68 = arith.mulf %64, %67 : vector<1x128xf32>
    %69 = tpu.concatenate %9, %11, %13, %15, %17, %19, %23, %25, %28, %34, %37, %44, %51, %58, %62, %68 in 0 : vector<1x128xf32>, vector<1x128xf32>, vector<1x128xf32>, vector<1x128xf32>, vector<1x128xf32>, vector<1x128xf32>, vector<1x128xf32>, vector<1x128xf32>, vector<1x128xf32>, vector<1x128xf32>, vector<1x128xf32>, vector<1x128xf32>, vector<1x128xf32>, vector<1x128xf32>, vector<1x128xf32>, vector<1x128xf32> -> vector<16x128xf32>
    %c0_27 = arith.constant 0 : index
    %c0_28 = arith.constant 0 : index
    %70 = vector.load %arg3[%c0_27, %c0_28] : memref<64x16xbf16, #tpu.memory_space<vmem>>, vector<64x16xbf16>
    %c0_29 = arith.constant 0 : index
    %c0_30 = arith.constant 0 : index
    %71 = vector.load %arg1[%c0_29, %c0_30] : memref<16x128xbf16, #tpu.memory_space<vmem>>, vector<16x128xbf16>
    %cst_31 = arith.constant dense<0.000000e+00> : vector<64x128xf32>
    %72 = tpu.matmul %70, %71, %cst_31 {dimension_numbers = #tpu.dot_dimension_numbers<[1], [0], [0], [1], [0, 0, 1, 1], [], []>} : vector<64x16xbf16>, vector<16x128xbf16>, vector<64x128xf32> -> vector<64x128xf32>
    %c0_32 = arith.constant 0 : index
    %c0_33 = arith.constant 0 : index
    %73 = vector.load %arg4[%c0_32, %c0_33] : memref<64x16xbf16, #tpu.memory_space<vmem>>, vector<64x16xbf16>
    %74 = arith.truncf %69 : vector<16x128xf32> to vector<16x128xbf16>
    %cst_34 = arith.constant dense<0.000000e+00> : vector<64x128xf32>
    %75 = tpu.matmul %73, %74, %cst_34 {dimension_numbers = #tpu.dot_dimension_numbers<[1], [0], [0], [1], [0, 0, 1, 1], [], []>} : vector<64x16xbf16>, vector<16x128xbf16>, vector<64x128xf32> -> vector<64x128xf32>
    %76 = arith.addf %72, %75 : vector<64x128xf32>
    %cst_35 = arith.constant 0.000000e+00 : f32
    %77 = vector.broadcast %cst_35 : f32 to vector<64x128xf32>
    %78 = arith.maximumf %76, %77 : vector<64x128xf32>
    %c0_36 = arith.constant 0 : index
    %c0_37 = arith.constant 0 : index
    %79 = vector.load %arg5[%c0_36, %c0_37] : memref<64x64xbf16, #tpu.memory_space<vmem>>, vector<64x64xbf16>
    %80 = arith.truncf %78 : vector<64x128xf32> to vector<64x128xbf16>
    %cst_38 = arith.constant dense<0.000000e+00> : vector<64x128xf32>
    %81 = tpu.matmul %79, %80, %cst_38 {dimension_numbers = #tpu.dot_dimension_numbers<[1], [0], [0], [1], [0, 0, 1, 1], [], []>} : vector<64x64xbf16>, vector<64x128xbf16>, vector<64x128xf32> -> vector<64x128xf32>
    %cst_39 = arith.constant 0.000000e+00 : f32
    %82 = vector.broadcast %cst_39 : f32 to vector<64x128xf32>
    %83 = arith.maximumf %81, %82 : vector<64x128xf32>
    %c0_40 = arith.constant 0 : index
    %c0_41 = arith.constant 0 : index
    %84 = vector.load %arg6[%c0_40, %c0_41] : memref<3x64xbf16, #tpu.memory_space<vmem>>, vector<3x64xbf16>
    %85 = arith.truncf %83 : vector<64x128xf32> to vector<64x128xbf16>
    %cst_42 = arith.constant dense<0.000000e+00> : vector<3x128xf32>
    %86 = tpu.matmul %84, %85, %cst_42 {dimension_numbers = #tpu.dot_dimension_numbers<[1], [0], [0], [1], [0, 0, 1, 1], [], []>} : vector<3x64xbf16>, vector<64x128xbf16>, vector<3x128xf32> -> vector<3x128xf32>
    %87 = arith.negf %86 : vector<3x128xf32>
    %88 = math.exp %87 : vector<3x128xf32>
    %cst_43 = arith.constant 1.000000e+00 : f32
    %89 = vector.broadcast %cst_43 : f32 to vector<3x128xf32>
    %90 = arith.addf %89, %88 : vector<3x128xf32>
    %91 = arith.divf %89, %90 : vector<3x128xf32>
    %c0_44 = arith.constant 0 : index
    %c0_45 = arith.constant 0 : index
    %92 = vector.load %arg7[%c0_44, %c0_45] : memref<3x128xf32, #tpu.memory_space<vmem>>, vector<3x128xf32>
    tpu.vector_store %arg7[%c0_44, %c0_45], %91 {strides = array<i32>} : memref<3x128xf32, #tpu.memory_space<vmem>>, vector<3x128xf32>,
    return
  }
  func.func @transform_0(%arg0: i32) -> (i32, i32) {
    %c0_i32 = arith.constant 0 : i32
    %c0_i32_0 = arith.constant 0 : i32
    return %c0_i32, %arg0 : i32, i32
  }
  func.func @transform_1(%arg0: i32) -> (i32, i32) {
    %c0_i32 = arith.constant 0 : i32
    %c0_i32_0 = arith.constant 0 : i32
    return %c0_i32, %arg0 : i32, i32
  }
  func.func @transform_2(%arg0: i32) -> (i32, i32) {
    %c0_i32 = arith.constant 0 : i32
    %c0_i32_0 = arith.constant 0 : i32
    %c0_i32_1 = arith.constant 0 : i32
    return %c0_i32, %c0_i32_0 : i32, i32
  }
  func.func @transform_3(%arg0: i32) -> (i32, i32) {
    %c0_i32 = arith.constant 0 : i32
    %c0_i32_0 = arith.constant 0 : i32
    %c0_i32_1 = arith.constant 0 : i32
    return %c0_i32, %c0_i32_0 : i32, i32
  }
  func.func @transform_4(%arg0: i32) -> (i32, i32) {
    %c0_i32 = arith.constant 0 : i32
    %c0_i32_0 = arith.constant 0 : i32
    %c0_i32_1 = arith.constant 0 : i32
    return %c0_i32, %c0_i32_0 : i32, i32
  }
  func.func @transform_5(%arg0: i32) -> (i32, i32) {
    %c0_i32 = arith.constant 0 : i32
    %c0_i32_0 = arith.constant 0 : i32
    %c0_i32_1 = arith.constant 0 : i32
    return %c0_i32, %c0_i32_0 : i32, i32
  }
  func.func @transform_6(%arg0: i32) -> (i32, i32) {
    %c0_i32 = arith.constant 0 : i32
    %c0_i32_0 = arith.constant 0 : i32
    return %c0_i32, %arg0 : i32, i32
  }
}

</mosaic_0001>

<bundles_post_ra>
// kernel: volume_radiance.1
= control target key start
LH: loop header
LB: loop body
LE: loop exit
PB: predicated region body
PF: predicated region fallthrough
CT: control target
= control target key end

     0   :  { %s1106_s21 = smov 0   ;;  %s1108_s22 = smov 0   ;;  %s1234_s0 = inlined_call_operand.vmem [shape: bf16[16,256], index: 0, kind: input, shape index: {}]   ;;  %s1235_s1 = inlined_call_operand.vmem [shape: f32[3,256], index: 1, kind: input, shape index: {}]   ;;  %s1236_s2 = inlined_call_operand.vmem [shape: bf16[64,16], index: 2, kind: input, shape index: {}]   ;;  %s1237_s3 = inlined_call_operand.vmem [shape: bf16[64,16], index: 3, kind: input, shape index: {}]   ;;  %s1238_s4 = inlined_call_operand.vmem [shape: bf16[64,64], index: 4, kind: input, shape index: {}]   ;;  %s1239_s5 = inlined_call_operand.vmem [shape: bf16[3,64], index: 5, kind: input, shape index: {}]   ;;  %s1240_s6 = inlined_call_operand.vmem [shape: f32[3,256], index: 6, kind: output, shape index: {}]  }
   0x1   :  { %s1110_s23 = smov 0  }
   0x2 LB: > { %s890_s24 = sadd.s32 4294967295, %s1067_s23   ;;  %s1123_s25 = sadd.s32 1, %s1067_s23   ;;  %s1067_s23 = sphi %s1110_s23, %s1243_s23   ;;  %s1063_s22 = sphi %s1108_s22, %s1242_s22   ;;  %s1059_s21 = sphi %s1106_s21, %s1241_s21  }
   0x3   : > { %s20_s26 = ssub.s32 %s1067_s23, %s1123_s25  ;;  %s23_s27 = sadd.s32 1, %s1063_s22 }
   0x4   : > { %p21_p0 = scmp.eq.s32.totalorder %s20_s26, 0  ;;  %p30_p1 = scmp.ne.s32.totalorder %s1063_s22, %s1059_s21 }
   0x5   : > { %p31_p2 = scmp.eq.s32.totalorder %s1067_s23, 0  ;;  %p893_p4 = scmp.ge.s32.totalorder %s1067_s23, 2 }
   0x6   : > { %s1132_s28 = scalar_select %p21_p0, %s1063_s22, %s23_s27  }
   0x7   : > { %p32_p3 = por %p31_p2, %p30_p1  ;;  %204 = sbr.rel (%p893_p4) target bundleno = 17 (0x11), region = 32 }
   0xc   : > { %207 = sbr.rel (!%p32_p3) target bundleno = 17 (0x11), region = 36  ;;  %s209_s29 = sand.u32 (%p32_p3), 1, %s1063_s22  }
   0xd   : > { %s895_s30 = sshll.u32 (%p32_p3), %s1067_s23, 2  ;;  %s894_s7 = sshll.u32 (%p32_p3), %s209_s29, 3 }
   0xe   : > { %s213_s10 = scalar_lea.vmem (%p32_p3), %s1234_s0, %s895_s30  ;;  %s211_s11 = scalar_lea.vmem (%p32_p3), [#allocation2], %s894_s7 }
   0xf   : > { %v230_v0 = vld [vmem:[%s213_s10] sm:$0xf] (%p32_p3)  ;;  %v232_v1 = vld [vmem:[%s213_s10 + $0x8] sm:$0xf] (%p32_p3) }
  0x10   : > { %231 = vst [vmem:[%s211_s11] sm:$0xf] (%p32_p3), %v230_v0  ;;  %233 = vst [vmem:[%s211_s11 + $0x4] sm:$0xf] (%p32_p3), %v232_v1 }
  0x11 PF: > { %p896_p5 = scmp.ge.s32.totalorder %s1067_s23, 1  ;;  %p267_p6 = scmp.lt.s32.totalorder %s1067_s23, 3 }
  0x13   : > { %p268_p7 = pnand %p896_p5, %p267_p6 }
  0x14   : > { %s274_s12 = sand.u32 (!%p268_p7), 1, %s1059_s21   ;;  %p306_p8 = scmp.lt.s32.totalorder (!%p268_p7), %s890_s24, 1 }
  0x15   : > { %271 = sbr.rel (%p268_p7) target bundleno = 732 (0x2dc), region = 81  ;;  %s897_s13 = sshll.u32 (!%p268_p7), %s274_s12, 3 }
  0x16   : > { %s276_s16 = scalar_lea.vmem (!%p268_p7), [#allocation2], %s897_s13 }
  0x1a   : > { %vm457_vm0 = vcmask 130048   ;;  %v1029_v2 = vld [vmem:[%s1236_s2] sm:$0xff]   ;;  %v1030_v4 = vld [vmem:[%s1236_s2 + $0x8] sm:$0xff]   ;;  %s1245_s24 = smov (!%p306_p8, %s890_s24), 1  ;;  %v1033_v6 = vld [vmem:[%s1236_s2 + $0x10] sm:$0xff]   ;;  %vm397_vm1 = vcmask 1040384  }
  0x1b   : > { %v1028_v3 = vld [vmem:[%s276_s16] sm:$0xff]   ;;  %966 = vmatprep.mubr.msk.bf16.mxu1 %vm457_vm0, %v1029_v2  ;;  %s898_s21 = sshll.u32 %s1245_s24, 2  ;;  %v1034_v21 = vld [vmem:[%s1236_s2 + $0x18] sm:$0xff]   ;;  %vm399_vm2 = vcmask 1041408   ;;  %vm401_vm3 = vcmask 1042432   ;;  %vm403_vm4 = vcmask 1043456  }
  0x1c   : > { %964 = vmatprep.subr.bf16.mxu1 %v1028_v3  ;;  %v1031_v5 = vld [vmem:[%s1237_s3] sm:$0xff]   ;;  %s309_s29 = scalar_lea.vmem %s1235_s1, %s898_s21  ;;  %vm405_vm5 = vcmask 1044480   ;;  %vm407_vm6 = vcmask 1045504   ;;  %vm409_vm7 = vcmask 1046528   ;;  %vm678_vm8 = vcmask 523264   ;;  %s313_s8 = scalar_lea.vmem %s1240_s6, %s898_s21 }
  0x1d   : > { %965 = vmatpush3.bf16.msra.mxu1 %v1028_v3  ;;  %956 = vmatprep.mubr.msk.bf16.mxu0 %vm457_vm0, %v1031_v5  ;;  %v315_v7 = vld [vmem:[%s309_s29] sm:$0x1]  ;;  %v316_v8 = vld [vmem:[%s309_s29 + $0x1] sm:$0x1]  ;;  %v317_v9 = vld [vmem:[%s309_s29 + $0x2] sm:$0x1] }
  0x1e   : > { %v318_v10 = vmul.f32 %v315_v7, %v315_v7  ;;  %v319_v11 = vmul.f32 %v316_v8, %v316_v8  ;;  %v320_v12 = vmul.f32 %v317_v9, %v317_v9  ;;  %v321_v13 = vmul.f32 %v316_v8, %v315_v7 }
  0x1f   : > { %v322_v14 = vmul.f32 %v317_v9, %v316_v8  ;;  %v323_v15 = vmul.f32 %v317_v9, %v315_v7  ;;  %v324_v16 = vmul.f32 -0.48860252, %v316_v8  ;;  %v325_v17 = vmul.f32 0.48860252, %v317_v9 }
  0x20   : > { %967 = vmatmul.mubr.msk.bf16.vlgmr.msra.gmra.mxu1 %vm457_vm0, %v1030_v4  ;;  %v326_v18 = vmul.f32 -0.48860252, %v315_v7  ;;  %v327_v19 = vmul.f32 1.0925485, %v321_v13  ;;  %v332_v20 = vsub.f32 %v318_v10, %v319_v11  ;;  %v329_v23 = vmul.f32 0.9461747, %v320_v12 }
  0x21   : > { %970 = vmatprep.mubr.msk.bf16.mxu1 %vm457_vm0, %v1033_v6  ;;  %v328_v22 = vmul.f32 -1.0925485, %v322_v14  ;;  %v331_v24 = vmul.f32 -1.0925485, %v323_v15  ;;  %v334_v26 = vmul.f32 0.5900436, %v316_v8 }
  0x22   : > { %v333_v25 = vmul.f32 0.54627424, %v332_v20  ;;  %v335_v27 = vmul.f32 -3.0, %v318_v10  ;;  %v341_v28 = vmul.f32 5.0, %v320_v12  ;;  %v338_v29 = vmul.f32 2.8906114, %v321_v13 }
  0x23   : > { %v340_v30 = vmul.f32 0.4570458, %v316_v8  ;;  %v344_v31 = vmul.f32 0.37317634, %v317_v9  ;;  %v347_v35 = vmul.f32 0.4570458, %v315_v7 }
  0x24   : > { %v336_v32 = vadd.f32 %v335_v27, %v319_v11  ;;  %v342_v33 = vsub.f32 1.0, %v341_v28  ;;  %v901_v34 = vadd.f32 -3.0, %v341_v28  ;;  %v339_v36 = vmul.f32 %v338_v29, %v317_v9  ;;  %v1032_v13 = vld [vmem:[%s1237_s3 + $0x8] sm:$0xff]   ;;  %v1035_v14 = vld [vmem:[%s1237_s3 + $0x10] sm:$0xff]   ;;  %v1036_v15 = vld [vmem:[%s1237_s3 + $0x18] sm:$0xff]  }
  0x25   : > { %v349_v37 = vmul.f32 1.4453057, %v317_v9  ;;  %v351_v38 = vmul.f32 0.5900436, %v315_v7  ;;  %v352_v39 = vmul.f32 3.0, %v319_v11  ;;  %v356_v45 = vrot.slane %v324_v16, 7 }
  0x26   : > { %v337_v40 = vmul.f32 %v336_v32, %v334_v26  ;;  %v343_v41 = vmul.f32 %v342_v33, %v340_v30  ;;  %v346_v42 = vmul.f32 %v901_v34, %v344_v31  ;;  %v348_v43 = vmul.f32 %v347_v35, %v342_v33  ;;  %v1037_v16 = vld [vmem:[%s1238_s4] sm:$0xff]  }
  0x27   : > { %v353_v44 = vsub.f32 %v318_v10, %v352_v39  ;;  %v900_v46 = vadd.f32 -0.31539157, %v329_v23  ;;  %v350_v47 = vmul.f32 %v349_v37, %v332_v20  ;;  %v359_v48 = vrot.slane %v325_v17, 6 }
  0x28   : > { %971 = vmatmul.mubr.msk.bf16.gmra.mxu1 %vm457_vm0, %v1034_v21  ;;  %v362_v50 = vrot.slane %v326_v18, 5  ;;  %v377_v51 = vrot.slane %v337_v40, 7  ;;  %v380_v52 = vrot.slane %v339_v36, 6  ;;  %v365_v53 = vrot.slane %v327_v19, 4 }
  0x29   : > { %v354_v49 = vmul.f32 %v353_v44, %v351_v38  ;;  %v383_v54 = vrot.slane %v343_v41, 5  ;;  %v386_v55 = vrot.slane %v346_v42, 4  ;;  %v368_v56 = vrot.slane %v328_v22, 3 }
  0x2a   : > { %v389_v57 = vrot.slane %v348_v43, 3  ;;  %v398_v58 = vsel %vm397_vm1, 0.2820948, %v356_v45  ;;  %v411_v59 = vsel %vm397_vm1, %v333_v25, %v377_v51  ;;  %v371_v60 = vrot.slane %v900_v46, 2 }
  0x2b   : > { %v392_v61 = vrot.slane %v350_v47, 2  ;;  %v400_v62 = vsel %vm399_vm2, %v398_v58, %v359_v48  ;;  %v412_v63 = vsel %vm399_vm2, %v411_v59, %v380_v52  ;;  %v374_v0 = vrot.slane %v331_v24, 1 }
  0x2c   : > { %v395_v1 = vrot.slane %v354_v49, 1  ;;  %v402_v2 = vsel %vm401_vm3, %v400_v62, %v362_v50  ;;  %v413_v3 = vsel %vm401_vm3, %v412_v63, %v383_v54  ;;  %v1039_v54 = vld [vmem:[%s1238_s4 + $0x10] sm:$0xff]   ;;  %vm1070_vm9 = vmmov 0  }
  0x2d   : > { %v404_v4 = vsel %vm403_vm4, %v402_v2, %v365_v53  ;;  %v414_v5 = vsel %vm403_vm4, %v413_v3, %v386_v55  ;;  %v1038_v53 = vld [vmem:[%s1238_s4 + $0x8] sm:$0xff]   ;;  %v1040_v55 = vld [vmem:[%s1238_s4 + $0x18] sm:$0xff]  }
  0x2e   : > { %v406_v6 = vsel %vm405_vm5, %v404_v4, %v368_v56  ;;  %v415_v7 = vsel %vm405_vm5, %v414_v5, %v389_v57  ;;  %v1069_v56 = vmov 0.0  }
  0x2f   : > { %v408_v8 = vsel %vm407_vm6, %v406_v6, %v371_v60  ;;  %v416_v9 = vsel %vm407_vm6, %v415_v7, %v392_v61  ;;  %990 = vmatprep.subr.bf16.mxu1 %v1069_v56  ;;  %998 = vmatprep.mubr.msk.bf16.mxu1 %vm1070_vm9, %v1069_v56 }
  0x30   : > { %v410_v10 = vsel %vm409_vm7, %v408_v8, %v374_v0  ;;  %v417_v11 = vsel %vm409_vm7, %v416_v9, %v395_v1 }
  0x31   : > { %v436_v12 = vpack.c.bf16 %v417_v11, %v410_v10 }
  0x33   : > { %954 = vmatprep.subr.bf16.mxu0 %v436_v12 }
  0x34   : > { %955 = vmatpush3.bf16.msra.mxu0 %v436_v12 }
  0x37   : > { %957 = vmatmul.mubr.msk.bf16.vlgmr.msra.gmra.mxu0 %vm457_vm0, %v1032_v13  ;;  %v764_v13 = vld [vmem:[%s1239_s5] sm:$0x3] }
  0x38   : > { %960 = vmatprep.mubr.msk.bf16.mxu0 %vm457_vm0, %v1035_v14 }
  0x3f   : > { %961 = vmatmul.mubr.msk.bf16.gmra.mxu0 %vm457_vm0, %v1036_v15 }
  0x40   : > { %982 = vmatprep.mubr.msk.bf16.mxu0 %vm678_vm8, %v1037_v16 }
  0xe0   : > { %v968_v17 = vpop.f32.mrf.mxu1 }
  0xe2   : > { %v607_v18 = vpop.f32.mrf.mxu1 }
  0xe4   : > { %v969_v19 = vpop.f32.mrf.mxu1 }
  0xe6   : > { %v610_v20 = vpop.f32.mrf.mxu1 }
  0xe8   : > { %v972_v23 = vpop.f32.mrf.mxu1 }
  0xea   : > { %v623_v25 = vpop.f32.mrf.mxu1 }
  0xec   : > { %v973_v28 = vpop.f32.mrf.mxu1 }
  0xee   : > { %v626_v34 = vpop.f32.mrf.mxu1 }
  0xf7   : > { %v958_v21 = vpop.f32.mrf.mxu0 }
  0xf8   : > { %v616_v40 = vadd.f32 %v968_v17, %v958_v21 }
  0xf9   : > { %v504_v22 = vpop.f32.mrf.mxu0 }
  0xfa   : > { %v640_v47 = vmax.f32 %v616_v40, 0.0  ;;  %v608_v48 = vadd.f32 %v607_v18, %v504_v22 }
  0xfb   : > { %v959_v24 = vpop.f32.mrf.mxu0 }
  0xfc   : > { %v619_v36 = vadd.f32 %v969_v19, %v959_v24  ;;  %v638_v51 = vmax.f32 %v608_v48, 0.0 }
  0xfd   : > { %v507_v26 = vpop.f32.mrf.mxu0 }
  0xfe   : > { %v641_v44 = vmax.f32 %v619_v36, 0.0  ;;  %v611_v45 = vadd.f32 %v610_v20, %v507_v26 }
  0xff   : > { %v962_v27 = vpop.f32.mrf.mxu0 }
 0x100   : > { %v632_v30 = vadd.f32 %v972_v23, %v962_v27  ;;  %v655_v49 = vpack.c.bf16 %v641_v44, %v640_v47  ;;  %v639_v50 = vmax.f32 %v611_v45, 0.0 }
 0x101   : > { %v520_v29 = vpop.f32.mrf.mxu0 }
 0x102   : > { %v624_v32 = vadd.f32 %v623_v25, %v520_v29  ;;  %v644_v37 = vmax.f32 %v632_v30, 0.0  ;;  %v654_v52 = vpack.c.bf16 %v639_v50, %v638_v51 }
 0x103   : > { %v963_v31 = vpop.f32.mrf.mxu0 }
 0x104   : > { %v635_v33 = vadd.f32 %v973_v28, %v963_v31  ;;  %v642_v41 = vmax.f32 %v624_v32, 0.0 }
 0x105   : > { %v523_v35 = vpop.f32.mrf.mxu0 }
 0x106   : > { %v645_v38 = vmax.f32 %v635_v33, 0.0  ;;  %v627_v39 = vadd.f32 %v626_v34, %v523_v35 }
 0x108   : > { %v657_v42 = vpack.c.bf16 %v645_v38, %v644_v37  ;;  %v643_v43 = vmax.f32 %v627_v39, 0.0 }
 0x10a   : > { %v656_v46 = vpack.c.bf16 %v643_v43, %v642_v41  ;;  %974 = vmatprep.subr.bf16.mxu0 %v657_v42 }
 0x10b   : > { %975 = vmatpush3.bf16.msra.mxu0 %v657_v42 }
 0x10c   : > { %976 = vmatprep.subr.bf16.mxu0 %v656_v46 }
 0x10f   : > { %977 = vmatpush3.bf16.msra.mxu0 %v656_v46 }
 0x110   : > { %978 = vmatprep.subr.bf16.mxu0 %v655_v49 }
 0x113   : > { %979 = vmatpush3.bf16.msra.mxu0 %v655_v49 }
 0x114   : > { %980 = vmatprep.subr.bf16.mxu0 %v654_v52 }
 0x117   : > { %981 = vmatpush3.bf16.msra.mxu0 %v654_v52 }
 0x11a   : > { %983 = vmatmul.mubr.msk.bf16.vlgmr.msra.gmra.mxu0 %vm678_vm8, %v1038_v53 }
 0x11b   : > { %986 = vmatprep.mubr.msk.bf16.mxu0 %vm678_vm8, %v1039_v54 }
 0x122   : > { %987 = vmatmul.mubr.msk.bf16.gmra.mxu0 %vm678_vm8, %v1040_v55 }
 0x1da   : > { %v984_v57 = vpop.f32.mrf.mxu0 }
 0x1db   : > { %v758_v8 = vmax.f32 %v984_v57, 0.0 }
 0x1dc   : > { %v725_v58 = vpop.f32.mrf.mxu0 }
 0x1dd   : > { %v756_v11 = vmax.f32 %v725_v58, 0.0 }
 0x1de   : > { %v985_v59 = vpop.f32.mrf.mxu0 }
 0x1df   : > { %v759_v6 = vmax.f32 %v985_v59, 0.0 }
 0x1e0   : > { %v728_v60 = vpop.f32.mrf.mxu0 }
 0x1e1   : > { %v766_v9 = vpack.c.bf16 %v759_v6, %v758_v8  ;;  %v757_v10 = vmax.f32 %v728_v60, 0.0 }
 0x1e2   : > { %v988_v61 = vpop.f32.mrf.mxu0 }
 0x1e3   : > { %v762_v0 = vmax.f32 %v988_v61, 0.0  ;;  %v765_v12 = vpack.c.bf16 %v757_v10, %v756_v11 }
 0x1e4   : > { %v741_v62 = vpop.f32.mrf.mxu0 }
 0x1e5   : > { %v760_v5 = vmax.f32 %v741_v62, 0.0 }
 0x1e6   : > { %v989_v63 = vpop.f32.mrf.mxu0 }
 0x1e7   : > { %v763_v1 = vmax.f32 %v989_v63, 0.0 }
 0x1e8   : > { %v744_v2 = vpop.f32.mrf.mxu0 }
 0x1e9   : > { %v768_v3 = vpack.c.bf16 %v763_v1, %v762_v0  ;;  %v761_v4 = vmax.f32 %v744_v2, 0.0 }
 0x1eb   : > { %991 = vmatpush3.bf16.msra.mxu1 %v768_v3  ;;  %v767_v7 = vpack.c.bf16 %v761_v4, %v760_v5 }
 0x1ec   : > { %992 = vmatprep.subr.bf16.mxu1 %v1069_v56 }
 0x1ef   : > { %993 = vmatpush3.bf16.msra.mxu1 %v767_v7 }
 0x1f0   : > { %994 = vmatprep.subr.bf16.mxu1 %v1069_v56 }
 0x1f3   : > { %995 = vmatpush3.bf16.msra.mxu1 %v766_v9 }
 0x1f4   : > { %996 = vmatprep.subr.bf16.mxu1 %v1069_v56 }
 0x1f7   : > { %997 = vmatpush3.bf16.msra.mxu1 %v765_v12 }
 0x1fa   : > { %999 = vmatmul.mubr.msk.bf16.vlgmr.msra.gmra.mxu1 %vm678_vm8, %v764_v13 }
 0x2ba   : > { %v806_v14 = vpop.f32.mrf.mxu1 }
 0x2bb   : > { %v928_v15 = vmul.f32 -1.442695, %v806_v14 }
 0x2bc   : > { %v1000_v16 = vpop.f32.mrf.mxu1 }
 0x2bd   : > { %1041 = vpow2.f32 %v928_v15 }
 0x2be   : > { %v809_v17 = vpop.f32.mrf.mxu1 }
 0x2c0   : > { %v1001_v18 = vpop.f32.mrf.mxu1 }
 0x2ca   : > { %v1042_v19 = vpop.eup %1041 }
 0x2cb   : > { %v815_v20 = vadd.f32 1.0, %v1042_v19 }
 0x2cd   : > { %1043 = vrcp.f32 %v815_v20 }
 0x2da   : > { %v1044_v21 = vpop.eup %1043 }
 0x2db   : > { %818 = vst [vmem:[%s313_s8] sm:$0x7] %v1044_v21 }
 0x2dc PF: > { %p13_p9 = scmp.ge.s32.totalorder %s1123_s25, 4   ;;  %s1241_s21 = smov %s1063_s22 }
 0x2dd   : > { %s1242_s22 = smov %s1132_s28  ;;  %s1243_s23 = smov %s1123_s25 }
 0x2de   :  { %15 = sbr.rel (!%p13_p9) target bundleno = 2 (0x2), region = 123 }

</bundles_post_ra>
